<compile_context>
chip_gen: v6e
topology: v6e:2x2x1
jax: 0.10.0
libtpu: 0.0.40
codegen_flags: <defaults>
</compile_context>

<pallas_src>
import functools

import jax
import jax.numpy as jnp
from jax import lax
from jax.experimental import pallas as pl
from jax.experimental.pallas import tpu as pltpu

_NEG_FILL = -1e30   # "-inf" fill for max-pool (all real values lie in [0, 1])
_POS_FILL = 1e30    # "+inf" fill for min-pool


def _tpu_vmem_capacity_bytes():
    """Per-core VMEM capacity; conservative 64 MiB (v7x) fallback if unavailable."""
    try:
        cap = int(pltpu.get_tpu_info().vmem_capacity_bytes)
        if cap > 0:
            return cap
    except Exception:
        pass
    return 64 << 20


def _vmem_limit(nbytes, cap):
    # Generation-aware scoped-VMEM limit: keep ~8 MiB headroom for compiler scratch.
    return int(min(max(nbytes, 32 << 20), cap - (8 << 20)))


# ------------------------- kernel 1: foreground prob --------------------------
def _fg_prob_kernel(pred_ref, p_ref, *, n_cls):
    """p = softmax(logits, axis=C)[1] for one (1, C, tH, W) block, channel-streamed."""
    x = lambda c: pred_ref[0, c].astype(jnp.float32)
    m = x(0)
    for c in range(1, n_cls):                 # C is static (class count)
        m = jnp.maximum(m, x(c))
    e1 = None
    s = None
    for c in range(n_cls):
        e = jnp.exp(x(c) - m)
        s = e if s is None else s + e
        if c == 1:
            e1 = e                            # only channel 1 is used downstream
    p_ref[0] = e1 / s


# --------------------------- kernel 2: clDice sums ----------------------------
def _cl_dice_kernel(p_hbm, tgt_hbm, out_ref, p_buf, t_buf, sem, *,
                    iterations, h_orig, w_orig, H_pad, W_pad,
                    tile_h, halo, buf_h, n_tiles, padded,
                    drop_row_ctr, drop_col_ctr, use_fori):
    b = pl.program_id(0)
    if n_tiles == 1:
        start = 0
        t = 0
    else:
        t = pl.program_id(1)
        start = jnp.clip(t * tile_h - halo, 0, H_pad - buf_h)
        start = pl.multiple_of(start, 8)      # all tiling quantities are multiples of 8

    # One-shot DMA of this tile's halo-extended rows.  Kernel 2 is heavily
    # compute-bound (>25x over its HBM traffic) so no double buffering: saves VMEM.
    cp_p = pltpu.make_async_copy(p_hbm.at[b, pl.ds(start, buf_h)], p_buf, sem.at[0])
    cp_t = pltpu.make_async_copy(tgt_hbm.at[b, pl.ds(start, buf_h)], t_buf, sem.at[1])
    cp_p.start()
    cp_t.start()
    cp_p.wait()
    cp_t.wait()

    row1 = lax.broadcasted_iota(jnp.int32, (buf_h, W_pad), 0) + start   # absolute row
    col1 = lax.broadcasted_iota(jnp.int32, (buf_h, W_pad), 1)

    def load_p():
        v = p_buf[...]
        if padded:
            # padded logits give p = 1/C there; zero so the reductions see exactly 0.
            v = jnp.where(jnp.logical_and(row1 < h_orig, col1 < w_orig), v, 0.0)
        return v

    def load_g():
        g = t_buf[...].astype(jnp.float32)
        return jnp.where(g > 1.0, 0.0, g)     # ignore labels (e.g. 255) -> 0

    # Fused skeletonization slab: [pred prob, gt mask].
    x = jnp.concatenate([load_p()[None], load_g()[None]], axis=0)       # (2, buf_h, W)

    # Hoisted shift-validity masks w.r.t. the ORIGINAL image extent (absolute rows),
    # built once and reused ~40x by the min-pool inside the loop.
    row = lax.broadcasted_iota(jnp.int32, (2, buf_h, W_pad), 1) + start
    col = lax.broadcasted_iota(jnp.int32, (2, buf_h, W_pad), 2)
    m_rm1 = jnp.logical_and(row >= 1, row <= h_orig)   # source row i-1 valid
    m_rp1 = row < (h_orig - 1)                         # source row i+1 valid
    m_cm1 = jnp.logical_and(col >= 1, col <= w_orig)   # source col j-1 valid
    m_cp1 = col < (w_orig - 1)                         # source col j+1 valid

    # TODO(synk): if profiling shows the XLU binding after the VPU trims (v6e/v7x),
    # express the +/-1 row neighbours as sublane-offset loads from a VMEM scratch
    # instead of pltpu.roll(axis=1); not worth it on v5e (3 XLUs, VPU-bound).
    def minpool3x3(v):
        # Dedicated min-pool (no negations), separable lanes-then-sublanes.
        left = jnp.where(m_cm1, pltpu.roll(v, 1, axis=2), _POS_FILL)
        right = jnp.where(m_cp1, pltpu.roll(v, W_pad - 1, axis=2), _POS_FILL)
        v = jnp.minimum(jnp.minimum(left, v), right)
        up = jnp.where(m_rm1, pltpu.roll(v, 1, axis=1), _POS_FILL)
        down = jnp.where(m_rp1, pltpu.roll(v, buf_h - 1, axis=1), _POS_FILL)
        return jnp.minimum(jnp.minimum(up, v), down)

    def maxpool3x3_nonneg(v):
        # v = mn >= 0 everywhere and exactly 0 on zero-padded rows/cols, so the
        # boundary selects are droppable whenever real zero padding exists in that
        # direction (rolled-in values are 0 <= window max, which contains the >=0
        # centre).  Row selects are only dropped in the un-tiled case (tile-internal
        # wrap would otherwise leak halo data into boundary core rows).
        left = pltpu.roll(v, 1, axis=2)
        right = pltpu.roll(v, W_pad - 1, axis=2)
        if not drop_col_ctr:
            left = jnp.where(m_cm1, left, _NEG_FILL)
            right = jnp.where(m_cp1, right, _NEG_FILL)
        v = jnp.maximum(jnp.maximum(left, v), right)
        up = pltpu.roll(v, 1, axis=1)
        down = pltpu.roll(v, buf_h - 1, axis=1)
        if not drop_row_ctr:
            up = jnp.where(m_rm1, up, _NEG_FILL)
            down = jnp.where(m_rp1, down, _NEG_FILL)
        return jnp.maximum(jnp.maximum(up, v), down)

    def skel_iter(v):
        mn = minpool3x3(v)                    # 3x3 min-pool
        contour = maxpool3x3_nonneg(mn) - mn  # window contains centre => >= 0
        return jnp.maximum(v - contour, 0.0)

    # TODO(synk): optional bf16 skeletonization on v6e/v7x (~1.7-1.9x on VPU/XLU and
    # half the VMEM); kept f32 for exact parity with the 1e-4 check and v5e support.
    if use_fori:
        x = lax.fori_loop(0, iterations, lambda _, v: skel_iter(v), x, unroll=2)
    else:
        for _ in range(iterations):           # small tiles: full unroll is cheapest
            x = skel_iter(x)

    skel_p, skel_g = x[0], x[1]
    if n_tiles > 1:
        # Each absolute row belongs to exactly one tile's core region.
        core = jnp.logical_and(row1 >= t * tile_h, row1 < (t + 1) * tile_h)
        skel_p = jnp.where(core, skel_p, 0.0)
        skel_g = jnp.where(core, skel_g, 0.0)

    # Re-load p/g from the still-resident input buffers instead of keeping them live
    # across the whole skeleton loop (frees ~8 B/px of live state).
    p = load_p()
    g = load_g()
    s1 = jnp.sum(skel_p * g)                  # sum(skel_pred * gt)
    s2 = jnp.sum(skel_p)                      # sum(skel_pred)
    s3 = jnp.sum(skel_g * p)                  # sum(skel_gt * pred)
    s4 = jnp.sum(skel_g)                      # sum(skel_gt)

    lane = lax.broadcasted_iota(jnp.int32, (1, 128), 1)
    vec = jnp.where(lane == 0, s1, 0.0)
    vec = jnp.where(lane == 1, s2, vec)
    vec = jnp.where(lane == 2, s3, vec)
    vec = jnp.where(lane == 3, s4, vec)
    out_ref[...] = vec.astype(jnp.float32).reshape(1, 1, 1, 128)


# --------------------------------- wrapper -----------------------------------
def cl_dice_per_sample(pred, target, *, iterations=10, epsilon=1e-6, tile_rows=None):
    """Per-sample (1 - clDice) losses, shape (N,). pred: NCHW logits, target: NHW labels.

    tile_rows: optional override of the kernel-2 core tile height (forces halo tiling).
    """
    N, C, H, W = pred.shape
    assert target.shape == (N, H, W)
    assert C >= 2, "clDice uses the channel-1 (foreground) probability"

    # No wrapper-side f32 casts of pred; only widen sub-32-bit label dtypes so the
    # (H, W) label plane keeps the 32-bit (8,128) tiling.
    if target.dtype.itemsize != 4:
        target = target.astype(jnp.int32)

    cap = _tpu_vmem_capacity_bytes()

    # Lane/sublane alignment.
    h_align = max(8, 32 // pred.dtype.itemsize)
    H_pad = -(-H // h_align) * h_align
    W_pad = -(-W // 128) * 128

    # ---- kernel-2 tiling decision: halo-tile over H when the full plane would not
    #      fit the per-generation VMEM budget (or when tile_rows forces it).
    BPP = 64                                   # rough resident VMEM bytes per buffer px
    budget = max(cap - (16 << 20), 24 << 20)
    halo_full = -(-2 * iterations // 8) * 8    # dependence radius of the skeleton loop
    if tile_rows is not None:
        tile_h, halo = max(8, (tile_rows // 8) * 8), halo_full
    elif H_pad * W_pad * BPP <= budget:
        tile_h, halo = H_pad, 0
    else:
        buf_rows = (budget // (W_pad * BPP)) // 8 * 8
        tile_h, halo = buf_rows - 2 * halo_full, halo_full
        if tile_h < 8:                         # plane too wide to tile usefully
            tile_h, halo = H_pad, 0
    if tile_h >= H_pad or tile_h + 2 * halo > H_pad:
        tile_h, halo = H_pad, 0                # whole-image (un-tiled) fallback
    buf_h = tile_h + 2 * halo
    n_tiles = -(-H_pad // tile_h)

    if n_tiles == 1:
        tile_h = buf_h = H_pad
        halo = 0
        # Un-tiled and no existing row padding: force one extra zero row-block so the
        # contour-pool row selects can be dropped (only when the image is tall enough
        # that +h_align rows is cheap relative to the ~10% VPU saving).
        if H_pad == H and H_pad >= 64:
            H_pad += h_align
            tile_h = buf_h = H_pad

    padded = (H_pad != H) or (W_pad != W)
    if padded:
        pred = jnp.pad(pred, ((0, 0), (0, 0), (0, H_pad - H), (0, W_pad - W)))
        target = jnp.pad(target, ((0, 0), (0, H_pad - H), (0, W_pad - W)))

    # ---- kernel 1: channel-1 softmax probability, tiled over H -------------------
    in_budget = max(8 << 20, cap // 6)         # double-buffered logit block budget
    t_h = H_pad
    while t_h % (2 * h_align) == 0 and 2 * C * t_h * W_pad * pred.dtype.itemsize > in_budget:
        t_h //= 2
    vmem1 = (2 * C * t_h * W_pad * pred.dtype.itemsize   # double-buffered logit blocks
             + 2 * t_h * W_pad * 4                       # double-buffered p output
             + 6 * t_h * W_pad * 4 + (2 << 20))          # streamed f32 working planes
    p = pl.pallas_call(
        functools.partial(_fg_prob_kernel, n_cls=C),
        out_shape=jax.ShapeDtypeStruct((N, H_pad, W_pad), jnp.float32),
        grid_spec=pltpu.PrefetchScalarGridSpec(
            num_scalar_prefetch=0,
            grid=(N, H_pad // t_h),
            in_specs=[pl.BlockSpec((1, C, t_h, W_pad), lambda b, h: (b, 0, h, 0))],
            out_specs=pl.BlockSpec((1, t_h, W_pad), lambda b, h: (b, h, 0)),
        ),
        compiler_params=pltpu.CompilerParams(
            dimension_semantics=("parallel", "parallel"),
            vmem_limit_bytes=_vmem_limit(vmem1, cap)),
    )(pred)

    # ---- kernel 2: halo-tiled soft-skeletonization + clDice partial sums ---------
    drop_col_ctr = W_pad > W
    drop_row_ctr = (n_tiles == 1) and (H_pad > H)
    use_fori = (buf_h * W_pad) >= (512 * 512)

    kernel = functools.partial(
        _cl_dice_kernel, iterations=iterations, h_orig=H, w_orig=W,
        H_pad=H_pad, W_pad=W_pad, tile_h=tile_h, halo=halo, buf_h=buf_h,
        n_tiles=n_tiles, padded=padded,
        drop_row_ctr=drop_row_ctr, drop_col_ctr=drop_col_ctr, use_fori=use_fori)
    vmem2 = BPP * buf_h * W_pad + (4 << 20)
    sums = pl.pallas_call(
        kernel,
        out_shape=jax.ShapeDtypeStruct((N, n_tiles, 1, 128), jnp.float32),
        grid_spec=pltpu.PrefetchScalarGridSpec(
            num_scalar_prefetch=0,
            grid=(N, n_tiles),
            in_specs=[pl.BlockSpec(memory_space=pl.ANY),    # p   (HBM, manual halo DMA)
                      pl.BlockSpec(memory_space=pl.ANY)],   # gt  (HBM, manual halo DMA)
            out_specs=pl.BlockSpec((1, 1, 1, 128), lambda b, t: (b, t, 0, 0)),
            scratch_shapes=[pltpu.VMEM((buf_h, W_pad), jnp.float32),
                            pltpu.VMEM((buf_h, W_pad), target.dtype),
                            pltpu.SemaphoreType.DMA((2,))],
        ),
        compiler_params=pltpu.CompilerParams(
            dimension_semantics=("parallel", "parallel"),
            vmem_limit_bytes=_vmem_limit(vmem2, cap)),
    )(p, target)

    # Combine per-tile partial sums and finish the (tiny) clDice ratio math in JAX.
    s = jnp.sum(sums, axis=1)[:, 0, :]          # (N, 128)
    eps = jnp.float32(epsilon)
    tprec = (s[:, 0] + eps) / (s[:, 1] + eps)
    tsens = (s[:, 2] + eps) / (s[:, 3] + eps)
    cld = 2.0 * (tprec * tsens) / (tprec + tsens)
    return 1.0 - cld


class ClDiceLossPallas:
    """Forward-only port of mmseg's ClDiceLoss (no learnable parameters)."""

    def __init__(self, reduction="mean", loss_weight=1.0, iterations=10,
                 thinner=False, epsilon=1e-6):
        # TODO(synk): thinner=True path (soft_skeletonize_thin) has no provided
        # definition; only the default soft_skeletonize path is implemented.
        assert not thinner, "thinner=True not supported"
        self.reduction = reduction
        self.loss_weight = loss_weight
        self.iterations = iterations
        self.epsilon = epsilon

    def __call__(self, pred, target):
        per_sample = cl_dice_per_sample(
            pred, target, iterations=self.iterations, epsilon=self.epsilon)
        # Effective reduction is always 'mean' (see NOTE at top of file).
        return self.loss_weight * jnp.mean(per_sample)


# ------------------------- pure-JAX reference (check) ------------------------
def _ref_maxpool3x3(x):
    H, W = x.shape
    xp = jnp.pad(x, ((1, 1), (1, 1)), constant_values=-jnp.inf)
    wins = [xp[dy:dy + H, dx:dx + W] for dy in range(3) for dx in range(3)]
    return jnp.max(jnp.stack(wins), axis=0)


def _ref_soft_skeletonize(x, iterations):
    for _ in range(iterations):
        mp = -_ref_maxpool3x3(-x)
        contour = jax.nn.relu(_ref_maxpool3x3(mp) - mp)
        x = jax.nn.relu(x - contour)
    return x


def _ref_loss(pred, target, iterations, epsilon, loss_weight):
    prob = jax.nn.softmax(pred.astype(jnp.float32), axis=1)
    p = prob[:, 1]
    g = target.astype(jnp.float32)
    g = jnp.where(g > 1.0, 0.0, g)
    sp = jax.vmap(lambda a: _ref_soft_skeletonize(a, iterations))(p)
    sg = jax.vmap(lambda a: _ref_soft_skeletonize(a, iterations))(g)
    tprec = (jnp.sum(sp * g, axis=(-2, -1)) + epsilon) / (jnp.sum(sp, axis=(-2, -1)) + epsilon)
    tsens = (jnp.sum(sg * p, axis=(-2, -1)) + epsilon) / (jnp.sum(sg, axis=(-2, -1)) + epsilon)
    cld = 2.0 * (tprec * tsens) / (tprec + tsens)
    return loss_weight * jnp.mean(1.0 - cld)


# ----------------------------------- main ------------------------------------
if __name__ == "__main__":
    def make_case(key, N, C, H, W):
        k1, k2, k3 = jax.random.split(key, 3)
        pred = jax.random.normal(k1, (N, C, H, W), dtype=jnp.float32)          # logits
        target = jax.random.bernoulli(k2, 0.3, (N, H, W)).astype(jnp.int32)    # binary mask
        ignore = jax.random.bernoulli(k3, 0.05, (N, H, W))
        target = jnp.where(ignore, 255, target)                                # ignore pixels
        return pred, target

    loss_mod = ClDiceLossPallas(reduction="mean", loss_weight=1.0,
                                iterations=10, thinner=False, epsilon=1e-6)

    keys = jax.random.split(jax.random.PRNGKey(0), 3)

    # Un-tiled path: aligned shape (no padding, full boundary masks) and unaligned
    # shape (padding + contour-pool select drops).
    for k, (N, C, H, W) in zip(keys[:2], [(2, 4, 16, 128), (2, 3, 20, 100)]):
        pred, target = make_case(k, N, C, H, W)
        loss = jax.block_until_ready(loss_mod(pred, target))
        ref = jax.block_until_ready(_ref_loss(pred, target, 10, 1e-6, 1.0))
        assert jnp.allclose(loss, ref, rtol=1e-4, atol=1e-5), \
            (N, C, H, W, float(loss), float(ref))

    # Halo-tiled kernel-2 path, forced at a small shape (4 tiles of 32 core rows,
    # halo 24, ragged last tile, padded W).
    pred, target = make_case(keys[2], 1, 3, 100, 100)
    per = jax.block_until_ready(
        cl_dice_per_sample(pred, target, iterations=10, epsilon=1e-6, tile_rows=32))
    loss = jnp.mean(per)
    ref = jax.block_until_ready(_ref_loss(pred, target, 10, 1e-6, 1.0))
    assert jnp.allclose(loss, ref, rtol=1e-4, atol=1e-5), (float(loss), float(ref))

    print("KERNEL_OK")
</pallas_src>

<mosaic_0001>
module attributes {stable_mosaic.version = 11 : i64} {
  func.func @_fg_prob_kernel(%arg0: i32, %arg1: i32, %arg2: memref<1x4x16x128xf32, #tpu.memory_space<vmem>>, %arg3: memref<1x16x128xf32, #tpu.memory_space<vmem>>) attributes {dimension_semantics = [#tpu.dimension_semantics<parallel>, #tpu.dimension_semantics<parallel>], iteration_bounds = array<i64: 2, 1>, scalar_prefetch = 0 : i64, scratch_operands = 0 : i64, tpu.core_type = #tpu.core_type<tc>, window_params = [{transform_indices = @transform_0, window_bounds = array<i64: 1, 4, 16, 128>}, {transform_indices = @transform_1, window_bounds = array<i64: 1, 16, 128>}]} {
    %c0 = arith.constant 0 : index
    %c0_0 = arith.constant 0 : index
    %c0_1 = arith.constant 0 : index
    %c0_2 = arith.constant 0 : index
    %0 = vector.load %arg2[%c0, %c0_0, %c0_1, %c0_2] : memref<1x4x16x128xf32, #tpu.memory_space<vmem>>, vector<1x1x16x128xf32>
    %1 = vector.shape_cast %0 : vector<1x1x16x128xf32> to vector<16x128xf32>
    %c0_3 = arith.constant 0 : index
    %c1 = arith.constant 1 : index
    %c0_4 = arith.constant 0 : index
    %c0_5 = arith.constant 0 : index
    %2 = vector.load %arg2[%c0_3, %c1, %c0_4, %c0_5] : memref<1x4x16x128xf32, #tpu.memory_space<vmem>>, vector<1x1x16x128xf32>
    %3 = vector.shape_cast %2 : vector<1x1x16x128xf32> to vector<16x128xf32>
    %4 = arith.maximumf %1, %3 : vector<16x128xf32>
    %c0_6 = arith.constant 0 : index
    %c2 = arith.constant 2 : index
    %c0_7 = arith.constant 0 : index
    %c0_8 = arith.constant 0 : index
    %5 = vector.load %arg2[%c0_6, %c2, %c0_7, %c0_8] : memref<1x4x16x128xf32, #tpu.memory_space<vmem>>, vector<1x1x16x128xf32>
    %6 = vector.shape_cast %5 : vector<1x1x16x128xf32> to vector<16x128xf32>
    %7 = arith.maximumf %4, %6 : vector<16x128xf32>
    %c0_9 = arith.constant 0 : index
    %c3 = arith.constant 3 : index
    %c0_10 = arith.constant 0 : index
    %c0_11 = arith.constant 0 : index
    %8 = vector.load %arg2[%c0_9, %c3, %c0_10, %c0_11] : memref<1x4x16x128xf32, #tpu.memory_space<vmem>>, vector<1x1x16x128xf32>
    %9 = vector.shape_cast %8 : vector<1x1x16x128xf32> to vector<16x128xf32>
    %10 = arith.maximumf %7, %9 : vector<16x128xf32>
    %c0_12 = arith.constant 0 : index
    %c0_13 = arith.constant 0 : index
    %c0_14 = arith.constant 0 : index
    %c0_15 = arith.constant 0 : index
    %11 = vector.load %arg2[%c0_12, %c0_13, %c0_14, %c0_15] : memref<1x4x16x128xf32, #tpu.memory_space<vmem>>, vector<1x1x16x128xf32>
    %12 = vector.shape_cast %11 : vector<1x1x16x128xf32> to vector<16x128xf32>
    %13 = arith.subf %12, %10 : vector<16x128xf32>
    %14 = math.exp %13 : vector<16x128xf32>
    %c0_16 = arith.constant 0 : index
    %c1_17 = arith.constant 1 : index
    %c0_18 = arith.constant 0 : index
    %c0_19 = arith.constant 0 : index
    %15 = vector.load %arg2[%c0_16, %c1_17, %c0_18, %c0_19] : memref<1x4x16x128xf32, #tpu.memory_space<vmem>>, vector<1x1x16x128xf32>
    %16 = vector.shape_cast %15 : vector<1x1x16x128xf32> to vector<16x128xf32>
    %17 = arith.subf %16, %10 : vector<16x128xf32>
    %18 = math.exp %17 : vector<16x128xf32>
    %19 = arith.addf %14, %18 : vector<16x128xf32>
    %c0_20 = arith.constant 0 : index
    %c2_21 = arith.constant 2 : index
    %c0_22 = arith.constant 0 : index
    %c0_23 = arith.constant 0 : index
    %20 = vector.load %arg2[%c0_20, %c2_21, %c0_22, %c0_23] : memref<1x4x16x128xf32, #tpu.memory_space<vmem>>, vector<1x1x16x128xf32>
    %21 = vector.shape_cast %20 : vector<1x1x16x128xf32> to vector<16x128xf32>
    %22 = arith.subf %21, %10 : vector<16x128xf32>
    %23 = math.exp %22 : vector<16x128xf32>
    %24 = arith.addf %19, %23 : vector<16x128xf32>
    %c0_24 = arith.constant 0 : index
    %c3_25 = arith.constant 3 : index
    %c0_26 = arith.constant 0 : index
    %c0_27 = arith.constant 0 : index
    %25 = vector.load %arg2[%c0_24, %c3_25, %c0_26, %c0_27] : memref<1x4x16x128xf32, #tpu.memory_space<vmem>>, vector<1x1x16x128xf32>
    %26 = vector.shape_cast %25 : vector<1x1x16x128xf32> to vector<16x128xf32>
    %27 = arith.subf %26, %10 : vector<16x128xf32>
    %28 = math.exp %27 : vector<16x128xf32>
    %29 = arith.addf %24, %28 : vector<16x128xf32>
    %30 = arith.divf %18, %29 : vector<16x128xf32>
    %c0_28 = arith.constant 0 : index
    %c0_29 = arith.constant 0 : index
    %c0_30 = arith.constant 0 : index
    %31 = vector.load %arg3[%c0_28, %c0_29, %c0_30] : memref<1x16x128xf32, #tpu.memory_space<vmem>>, vector<1x16x128xf32>
    %32 = vector.shape_cast %31 : vector<1x16x128xf32> to vector<16x128xf32>
    %33 = vector.shape_cast %30 : vector<16x128xf32> to vector<1x16x128xf32>
    tpu.vector_store %arg3[%c0_28, %c0_29, %c0_30], %33 {strides = array<i32>} : memref<1x16x128xf32, #tpu.memory_space<vmem>>, vector<1x16x128xf32>,
    return
  }
  func.func @transform_0(%arg0: i32, %arg1: i32) -> (i32, i32, i32, i32) {
    %c0_i32 = arith.constant 0 : i32
    %c0_i32_0 = arith.constant 0 : i32
    %c0_i32_1 = arith.constant 0 : i32
    return %arg0, %c0_i32, %arg1, %c0_i32_0 : i32, i32, i32, i32
  }
  func.func @transform_1(%arg0: i32, %arg1: i32) -> (i32, i32, i32) {
    %c0_i32 = arith.constant 0 : i32
    %c0_i32_0 = arith.constant 0 : i32
    return %arg0, %arg1, %c0_i32 : i32, i32, i32
  }
}

</mosaic_0001>

<bundles_post_ra>
// kernel: tpu_custom_call.1
= control target key start
LH: loop header
LB: loop body
LE: loop exit
PB: predicated region body
PF: predicated region fallthrough
CT: control target
= control target key end

     0   :  { %6 = vsyncpa [#allocation3], 0  ;;  %s693_s0 = inlined_call_operand.hbm [shape: f32[2,4,16,128], index: 0, kind: input, shape index: {}]   ;;  %s694_s1 = inlined_call_operand.hbm [shape: f32[2,16,128], index: 1, kind: output, shape index: {}]  }
   0x1   :  { %8 = vsyncpa [#allocation3 + $0x1], 0 }
   0x2   :  { %9 = vsyncpa [#allocation4], 0 }
   0x3   :  { %11 = vsyncpa [#allocation4 + $0x1], 0  ;;  %s546_s6 = smov 0   ;;  %s548_s7 = smov 0  }
   0x4   :  { %s550_s8 = smov 0   ;;  %s552_s9 = smov 0  }
   0x5   :  { %s554_s10 = smov 0   ;;  %s556_s11 = smov 0  }
   0x6 LB: > { %s311_s12 = sadd.s32 4294967295, %s528_s11   ;;  %s312_s13 = sadd.s32 4294967294, %s528_s11   ;;  %s528_s11 = sphi %s556_s11, %s17_s11   ;;  %s524_s10 = sphi %s554_s10, %s705_s10   ;;  %s520_s9 = sphi %s552_s9, %s704_s9   ;;  %s516_s8 = sphi %s550_s8, %s703_s8   ;;  %s512_s7 = sphi %s548_s7, %s702_s7   ;;  %s508_s6 = sphi %s546_s6, %s701_s6  }
   0x7   : > { %s29_s14 = sadd.s32 1, %s524_s10  ;;  %s38_s15 = sadd.s32 1, %s516_s8 }
   0x8   : > { %p31_p0 = scmp.ge.s32.totalorder %s29_s14, 2  ;;  %p45_p1 = scmp.ne.s32.totalorder %s516_s8, %s512_s7 }
   0x9   : > { %p46_p2 = scmp.eq.s32.totalorder %s528_s11, 0  ;;  %p51_p3 = scmp.ne.s32.totalorder %s512_s7, %s508_s6 }
   0xa   : > { %s707_s14 = smov (%p31_p0, %s29_s14), 0  ;;  %p52_p5 = scmp.eq.s32.totalorder %s311_s12, 0 }
   0xb   : > { %p587_p4 = por %p46_p2, %p45_p1  ;;  %s33_s17 = ssub.s32 %s524_s10, %s707_s14 }
   0xc   : > { %p77_p6 = scmp.eq.s32.totalorder %s311_s12, 1  ;;  %p36_p7 = scmp.eq.s32.totalorder %s33_s17, 0 }
   0xd   : > { %p593_p8 = por %p52_p5, %p51_p3  ;;  %p83_p10 = scmp.eq.s32.totalorder %s312_s13, 1 }
   0xe   : > { %p597_p9 = por %p77_p6, %p45_p1  ;;  %p346_p13 = scmp.lt.s32.totalorder %s528_s11, 2 }
   0xf   : > { %s602_s20 = scalar_select %p36_p7, %s516_s8, %s38_s15  }
  0x10   : > { %p604_p11 = por %p83_p10, %p51_p3  ;;  %s103_s22 = sand.u32 1, %s516_s8  }
  0x11   : > { %s315_s23 = sshll.u32 %s103_s22, 6  ;;  %s332_s24 = sshll.u32 %s524_s10, 10 }
  0x12   : > { %s115_s27 = scalar_lea.hbm %s693_s0, %s332_s24  ;;  %s107_s28 = scalar_lea.vmem [#allocation2], %s315_s23 }
  0x13   : > { %s116_s29 = sshll.u32 %s107_s28, 4  ;;  %p617_p0 = pnand %p346_p13, %p587_p4  ;;  %s117_s29 = int_to_ptr.vmem [resolvable:$true] %s116_s29 }
  0x14   : > { %p318_p1 = scmp.ge.s32.totalorder %s528_s11, 1  ;;  %s104_s2 = scalar_lea.sflag [#allocation3], %s103_s22 }
  0x15   : > { %p422_p2 = pneg %p617_p0  ;;  %s433_s3 = scalar_lea.vmem %s117_s29, 1024 }
  0x16   : > { %p434_p3 = scmp.ne.s32.totalorder %s117_s29, %s433_s3  ;;  %s530_s4 = smov [#allocation2]  }
  0x17   : > { %s438_s5 = sshll.u32 %s530_s4, 4  ;;  %s439_s5 = int_to_ptr.vmem [resolvable:$false] %s438_s5 }
  0x18   : > { %p436_p5 = pnand %p434_p3, %p422_p2  ;;  %s440_s12 = scalar_lea.vmem %s439_s5, 2048 }
  0x19   : > { %p441_p7 = scmp.lt.s32.totalorder %s117_s29, %s439_s5  ;;  %p442_p10 = scmp.lt.s32.totalorder %s440_s12, %s433_s3 }
  0x1a   : > { %p437_p6 = pneg %p436_p5 }
  0x1b   : > { %p443_p12 = por %p442_p10, %p441_p7 }
  0x1d   : > { %p444_p4 = pnand %p443_p12, %p437_p6 }
  0x1f   : > { %447 = shalt.err (!%p444_p4)
}
  0x20   : > { %s531_s13 = smov 128   ;;  %s532_s15 = smov 8  }
  0x21   : > { %341 = dma.hbm_to_vmem [thread:$0]  (!%p617_p0), %s115_s27, 1024, %s117_s29, %s104_s2, %s531_s13, %s531_s13, %s532_s15  }
  0x22   : > { %p124_p13 = scmp.lt.s32.totalorder %s528_s11, 3 }
  0x24   : > { %p125_p2 = pnand %p318_p1, %p124_p13 }
  0x25   : > { %s630_s16 = sand.u32 (!%p125_p2), 1, %s512_s7  }
  0x26   : > { %128 = sbr.rel (%p125_p2) target bundleno = 110 (0x6e), region = 24  ;;  %s319_s17 = sshll.u32 (!%p125_p2), %s630_s16, 6 }
  0x27   : > { %s131_s22 = scalar_lea.sflag (!%p125_p2), [#allocation3], %s630_s16  ;;  %s134_s23 = scalar_lea.vmem (!%p125_p2), [#allocation2], %s319_s17 }
  0x2b   : > { %499 = dma.done.wait (%p593_p8), %s131_s22, 1024  }
  0x2c   : > { %501 = vsyncadd (%p593_p8), %s131_s22, 4294966272  ;;  %v155_v0 = vld [vmem:[%s134_s23] sm:$0xff]  ;;  %v321_v1 = vld [vmem:[%s134_s23 + $0x10] sm:$0xff]  ;;  %s320_s18 = sshll.u32 %s630_s16, 4  ;;  %s333_s26 = sshll.u32 %s520_s9, 8 }
  0x2d   : > { %v323_v2 = vld [vmem:[%s134_s23 + $0x20] sm:$0xff]  ;;  %v160_v3 = vmax.f32 %v155_v0, %v321_v1  ;;  %v156_v4 = vld [vmem:[%s134_s23 + $0x8] sm:$0xff]  ;;  %v322_v5 = vld [vmem:[%s134_s23 + $0x18] sm:$0xff]  ;;  %s152_s24 = scalar_lea.vmem [#allocation5], %s320_s18  ;;  %s645_s29 = scalar_lea.hbm %s694_s1, %s333_s26 }
  0x2e   : > { %v325_v6 = vld [vmem:[%s134_s23 + $0x30] sm:$0xff]  ;;  %v161_v7 = vmax.f32 %v156_v4, %v322_v5  ;;  %v324_v8 = vld [vmem:[%s134_s23 + $0x28] sm:$0xff]  ;;  %v326_v10 = vld [vmem:[%s134_s23 + $0x38] sm:$0xff]  ;;  %s224_s25 = sshll.u32 %s152_s24, 4  ;;  %s209_s30 = scalar_lea.sflag [#allocation4], %s630_s16  ;;  %s640_s25 = int_to_ptr.vmem [resolvable:$true] %s224_s25 }
  0x2f   : > { %v165_v9 = vmax.f32 %v160_v3, %v323_v2  ;;  %s448_s2 = scalar_lea.vmem %s640_s25, 256  ;;  %s533_s9 = smov [#allocation5]  }
  0x30   : > { %v166_v11 = vmax.f32 %v161_v7, %v324_v8  ;;  %p449_p8 = scmp.ne.s32.totalorder %s640_s25, %s448_s2  ;;  %s452_s3 = sshll.u32 %s533_s9, 4  ;;  %s453_s3 = int_to_ptr.vmem [resolvable:$false] %s452_s3 }
  0x31   : > { %v170_v12 = vmax.f32 %v165_v9, %v325_v6  ;;  %s454_s4 = scalar_lea.vmem %s453_s3, 512  ;;  %p455_p1 = scmp.lt.s32.totalorder %s640_s25, %s453_s3 }
  0x32   : > { %v171_v13 = vmax.f32 %v166_v11, %v326_v10  ;;  %p450_p12 = pnand %p449_p8, %p597_p9  ;;  %p456_p3 = scmp.lt.s32.totalorder %s454_s4, %s448_s2 }
  0x33   : > { %v172_v14 = vsub.f32 %v155_v0, %v170_v12  ;;  %v178_v15 = vsub.f32 %v321_v1, %v170_v12  ;;  %v186_v16 = vsub.f32 %v323_v2, %v170_v12  ;;  %v194_v17 = vsub.f32 %v325_v6, %v170_v12 }
  0x34   : > { %v173_v18 = vsub.f32 %v156_v4, %v171_v13  ;;  %v179_v19 = vsub.f32 %v322_v5, %v171_v13  ;;  %v187_v23 = vsub.f32 %v324_v8, %v171_v13  ;;  %v195_v25 = vsub.f32 %v326_v10, %v171_v13  ;;  %p451_p0 = pneg %p450_p12  ;;  %p457_p5 = por %p456_p3, %p455_p1 }
  0x35   : > { %v174_v20 = vmul.f32 1.442695, %v172_v14  ;;  %v180_v21 = vmul.f32 1.442695, %v178_v15  ;;  %v188_v22 = vmul.f32 1.442695, %v186_v16 }
  0x36   : > { %v196_v24 = vmul.f32 1.442695, %v194_v17  ;;  %v176_v26 = vmul.f32 1.442695, %v173_v18  ;;  %v182_v27 = vmul.f32 1.442695, %v179_v19  ;;  %p458_p6 = pnand %p457_p5, %p451_p0 }
  0x37   : > { %400 = vpow2.f32 %v174_v20  ;;  %v190_v28 = vmul.f32 1.442695, %v187_v23  ;;  %v198_v29 = vmul.f32 1.442695, %v195_v25 }
  0x38   : > { %402 = vpow2.f32 %v180_v21 }
  0x39   : > { %404 = vpow2.f32 %v188_v22 }
  0x3a   : > { %406 = vpow2.f32 %v196_v24 }
  0x3b   : > { %408 = vpow2.f32 %v176_v26 }
  0x3c   : > { %410 = vpow2.f32 %v182_v27 }
  0x3d   : > { %412 = vpow2.f32 %v190_v28 }
  0x3e   : > { %414 = vpow2.f32 %v198_v29 }
  0x44   : > { %v401_v30 = vpop.eup %400 }
  0x45   : > { %v403_v31 = vpop.eup %402 }
  0x46   : > { %v405_v32 = vpop.eup %404  ;;  %v184_v33 = vadd.f32 %v403_v31, %v401_v30 }
  0x47   : > { %v407_v34 = vpop.eup %406 }
  0x48   : > { %v409_v35 = vpop.eup %408  ;;  %v192_v36 = vadd.f32 %v405_v32, %v184_v33 }
  0x49   : > { %v411_v37 = vpop.eup %410 }
  0x4a   : > { %v413_v38 = vpop.eup %412  ;;  %v200_v39 = vadd.f32 %v407_v34, %v192_v36  ;;  %v185_v40 = vadd.f32 %v411_v37, %v409_v35 }
  0x4b   : > { %v415_v41 = vpop.eup %414 }
  0x4c   : > { %416 = vrcp.f32 %v200_v39  ;;  %v193_v42 = vadd.f32 %v413_v38, %v185_v40 }
  0x4e   : > { %v201_v43 = vadd.f32 %v415_v41, %v193_v42 }
  0x50   : > { %418 = vrcp.f32 %v201_v43 }
  0x59   : > { %v417_v44 = vpop.eup %416 }
  0x5a   : > { %v203_v45 = vmul.f32 %v417_v44, %v403_v31 }
  0x5c   : > { %206 = vst [vmem:[%s152_s24] sm:$0xff] %v203_v45 }
  0x5d   : > { %v419_v46 = vpop.eup %418 }
  0x5e   : > { %v205_v47 = vmul.f32 %v419_v46, %v411_v37 }
  0x60   : > { %207 = vst [vmem:[%s152_s24 + $0x8] sm:$0xff] %v205_v47 }
  0x61   : > { %461 = shalt.err (!%p458_p6)
}
  0x62   : > { %s462_s5 = scalar_lea.hbm %s645_s29, 256  ;;  %s466_s15 = scalar_lea.hbm %s694_s1, 512 }
  0x63   : > { %p463_p7 = scmp.ne.s32.totalorder %s645_s29, %s462_s5  ;;  %p467_p13 = scmp.lt.s32.totalorder %s645_s29, %s694_s1 }
  0x64   : > { %p468_p2 = scmp.lt.s32.totalorder %s466_s15, %s462_s5 }
  0x65   : > { %p464_p10 = pnand %p463_p7, %p597_p9 }
  0x66   : > { %p469_p8 = por %p468_p2, %p467_p13 }
  0x67   : > { %p465_p4 = pneg %p464_p10 }
  0x69   : > { %p470_p12 = pnand %p469_p8, %p465_p4 }
  0x6b   : > { %473 = shalt.err (!%p470_p12)
}
  0x6c   : > { %s534_s23 = smov 128   ;;  %s535_s18 = smov 8  }
  0x6d   : > { %336 = dma.vmem_to_hbm [thread:$0]  (%p597_p9), %s640_s25, 256, %s645_s29, %s209_s30, %s534_s23, %s534_s23, %s535_s18  }
  0x6e PF: > { %s239_s24 = sand.u32 1, %s508_s6   ;;  %p700_p0 = scmp.ge.s32.totalorder %s528_s11, 2 }
  0x6f   : > { %s240_s26 = scalar_lea.sflag [#allocation4], %s239_s24 }
  0x70   : > { %p343_p1 = pnand %p700_p0, %p604_p11 }
  0x72   : > { %p344_p3 = pneg %p343_p1 }
  0x74   : > { %503 = dma.done.wait (%p344_p3), %s240_s26, 256  }
  0x75   : > { %505 = vsyncadd (%p344_p3), %s240_s26, 4294967040  ;;  %s17_s11 = sadd.s32 1, %s528_s11   ;;  %s701_s6 = smov %s512_s7 }
  0x76   : > { %p14_p5 = scmp.ge.s32.totalorder %s17_s11, 4   ;;  %s702_s7 = smov %s516_s8 }
  0x77   : > { %s703_s8 = smov %s602_s20  ;;  %s704_s9 = smov %s524_s10 }
  0x78   : > { %s705_s10 = smov %s707_s14  ;;  %16 = sbr.rel (!%p14_p5) target bundleno = 6 (0x6), region = 72 }
  0x7d   :  { %245 = vsyncpa [#allocation3], 1 }
  0x7e   :  { %247 = vsyncpa [#allocation3 + $0x1], 1 }
  0x7f   :  { %248 = vsyncpa [#allocation4], 1 }
  0x80   :  { %250 = vsyncpa [#allocation4 + $0x1], 1 }

</bundles_post_ra>
